<compile_context>
chip_gen: v7x
topology: tpu7x:2x2x1
jax: 0.10.0
libtpu: 0.0.40
codegen_flags: <defaults>
</compile_context>

<pallas_src>
import functools
import math

import jax
import jax.numpy as jnp
from jax.experimental import pallas as pl
from jax.experimental.pallas import tpu as pltpu

_BN_EPS = 1e-5
_NCLASSES = 20
_VMEM_LIMIT = 40 * 1024 * 1024      # fits v7x's 64 MiB/TC with headroom


# ------------------------------ small helpers -------------------------------

def _round_up(x, m):
    return (x + m - 1) // m * m


def _tile(d, pref, align):
    """Largest tile <= pref that divides d and is a multiple of align.
    Returns d itself when d <= pref; returns 0 when no aligned divisor exists
    (caller must pad)."""
    if d <= pref:
        return d
    t = (pref // align) * align
    while t >= align:
        if d % t == 0:
            return t
        t -= align
    return 0


def _default_gconv_tile():
    """128-lane group packing on 128x128-MXU chips (v5e and older), 256 on
    v6e/v7x (256x256 MXUs)."""
    try:
        kind = jax.devices()[0].device_kind.lower()
    except Exception:
        return 128
    if any(v in kind for v in ("v2", "v3", "v4", "v5")):
        return 128
    return 256


_GCONV_TILE = _default_gconv_tile()


def _pick_row_chunk(h, wp, stride):
    """Image rows per in-kernel chunk: divides h, even for stride 2, and keeps
    the f32 value-chain accumulator around <= 1024 x lane rows."""
    for r in range(h, 0, -1):
        if h % r:
            continue
        if stride == 2 and r % 2:
            continue
        if r * wp <= 1024:
            return r
    return 2 if stride == 2 else 1


# ------------------------------ Pallas kernels ------------------------------

def _mm_bias_kernel(*refs, relu, has_res):
    if has_res:
        lhs_ref, rhs_ref, b_ref, res_ref, out_ref = refs
    else:
        lhs_ref, rhs_ref, b_ref, out_ref = refs
        res_ref = None
    y = jnp.dot(lhs_ref[...], rhs_ref[...], preferred_element_type=jnp.float32)
    y = y + b_ref[...]
    if has_res:
        y = y + res_ref[...].astype(jnp.float32)
    if relu:
        y = jnp.maximum(y, 0.0)
    out_ref[...] = y.astype(out_ref.dtype)


def _gconv3x3_kernel(x_ref, w_ref, b_ref, o_ref, *, wp, row_chunk, stride,
                     h_img):
    # x_ref : ((H+3)*wp, T) bf16   flattened padded rows, one channel tile
    # w_ref : (9, T, T)    bf16    block-diagonal per-tap weights (BN folded)
    # b_ref : (1, T)       f32     folded BN shift
    # o_ref : (h_out, W, T) bf16   compacted output (stride 2: even rows only)
    W = o_ref.shape[1]
    T = o_ref.shape[2]
    mrows = row_chunk * wp
    for ci in range(h_img // row_chunk):
        base = ci * row_chunk * wp
        acc = None
        for t in range(9):
            ky, kx = t // 3, t % 3
            win = x_ref[pl.ds(base + ky * wp + kx, mrows), :]
            d = jnp.dot(win, w_ref[t], preferred_element_type=jnp.float32)
            acc = d if acc is None else acc + d
        y = jnp.maximum(acc + b_ref[...], 0.0).astype(o_ref.dtype)
        y3 = y.reshape(row_chunk, wp, T)          # wp % 8 == 0 -> free reshape
        if stride == 2:
            y3 = y3.reshape(row_chunk // 2, 2, wp, T)[:, 0]
            r0 = ci * (row_chunk // 2)
            o_ref[r0:r0 + row_chunk // 2, :, :] = y3[:, :W, :]
        else:
            r0 = ci * row_chunk
            o_ref[r0:r0 + row_chunk, :, :] = y3[:, :W, :]


def _maxpool_kernel(x_ref, o_ref):
    # x_ref : (Hp/2, 2, Wp/2, 2*C) bf16  padded stem output, column pairs in lanes
    # o_ref : (OH, OW, C)          bf16
    OH, OW, C = o_ref.shape
    taps = [(0, 0), (0, 1), (1, 0)]   # (block offset, sub index) for offsets 0,1,2
    m = None
    for di, s in taps:
        row = x_ref[di:di + OH, s, :, :]                      # (OH, Wp/2, 2C)
        for dj, r in taps:
            v = row[:, dj:dj + OW, r * C:(r + 1) * C]          # (OH, OW, C)
            m = v if m is None else jnp.maximum(m, v)
    o_ref[...] = m


# ------------------------------ layer wrappers ------------------------------

@functools.partial(jax.jit, static_argnames=("relu", "out_dtype"))
def _matmul_bias(lhs, rhs, bias, residual, relu, out_dtype):
    """out = maybe_relu(lhs @ rhs + bias [+ residual]).

    Single-shot K (every K in this net is <= 2048) so there is no reduction
    grid axis and no accumulator scratch; the whole epilogue is fused."""
    M, K = lhs.shape
    N = rhs.shape[1]
    lhs = lhs.astype(jnp.bfloat16)
    rhs = rhs.astype(jnp.bfloat16)
    has_res = residual is not None

    tm = _tile(M, 512, 16)
    Mp = M
    if tm == 0 or (M > 512 and tm < 128):
        Mp = _round_up(M, 256)
        tm = 256
    if Mp != M:
        lhs = jnp.pad(lhs, ((0, Mp - M), (0, 0)))
        if has_res:
            residual = jnp.pad(residual, ((0, Mp - M), (0, 0)))

    tn = _tile(N, 512, 128)
    Np = N
    if tn == 0:                        # not hit by this network; kept for safety
        Np = _round_up(N, 128)
        rhs = jnp.pad(rhs, ((0, 0), (0, Np - N)))
        bias = jnp.pad(bias, ((0, 0), (0, Np - N)))
        if has_res:
            residual = jnp.pad(residual, ((0, 0), (0, Np - N)))
        tn = _tile(Np, 512, 128)

    in_specs = [
        pl.BlockSpec((tm, K), lambda i, j: (i, 0)),
        pl.BlockSpec((K, tn), lambda i, j: (0, j)),
        pl.BlockSpec((1, tn), lambda i, j: (0, j)),
    ]
    args = [lhs, rhs, bias]
    if has_res:
        in_specs.append(pl.BlockSpec((tm, tn), lambda i, j: (i, j)))
        args.append(residual)

    out = pl.pallas_call(
        functools.partial(_mm_bias_kernel, relu=relu, has_res=has_res),
        out_shape=jax.ShapeDtypeStruct((Mp, Np), out_dtype),
        grid_spec=pltpu.PrefetchScalarGridSpec(
            num_scalar_prefetch=0,
            grid=(Mp // tm, Np // tn),
            in_specs=in_specs,
            out_specs=pl.BlockSpec((tm, tn), lambda i, j: (i, j)),
        ),
        compiler_params=pltpu.CompilerParams(
            dimension_semantics=("parallel", "parallel"),
            vmem_limit_bytes=_VMEM_LIMIT),
    )(*args)
    if Mp != M or Np != N:
        out = out[:M, :N]
    return out


def conv1x1_bn(x, w, bias, *, stride=1, relu, residual=None,
               out_dtype=jnp.bfloat16):
    """x: NHWC bf16, w: (Cin, Cout) bf16 (BN scale folded), bias: (1, Cout)."""
    if stride > 1:
        x = x[:, ::stride, ::stride, :]
    N, H, W, C = x.shape
    lhs = x.reshape(N * H * W, C)
    res = None if residual is None else residual.reshape(N * H * W, -1)
    out = _matmul_bias(lhs, w, bias, res, relu=relu, out_dtype=out_dtype)
    return out.reshape(N, H, W, w.shape[1])


@functools.partial(jax.jit, static_argnames=("stride",))
def _grouped_conv3x3(x, w_bd, bias, stride):
    """3x3 grouped conv (pad 1) + folded BN + ReLU, compacted (N,H,W,C) output.

    Stride 2: only even output rows are computed/stored in-kernel; the column
    subsample (::2) stays in XLA over the already-halved tensor."""
    N, H, W, C = x.shape
    T = w_bd.shape[-1]
    ct = C // T
    wp = _round_up(W + 2, 8)
    # pad: 1 top / 2 bottom / 1 left / (wp - W - 1) right -> flattened rows stay
    # in-bounds for the discarded right-edge columns of the shifted windows.
    xp = jnp.pad(x, ((0, 0), (1, 2), (1, wp - W - 1), (0, 0)))
    xf = xp.reshape(N, (H + 3) * wp, C)
    h_out = H if stride == 1 else H // 2
    row_chunk = _pick_row_chunk(H, wp, stride)

    out = pl.pallas_call(
        functools.partial(_gconv3x3_kernel, wp=wp, row_chunk=row_chunk,
                          stride=stride, h_img=H),
        out_shape=jax.ShapeDtypeStruct((N, h_out, W, C), jnp.bfloat16),
        grid_spec=pltpu.PrefetchScalarGridSpec(
            num_scalar_prefetch=0,
            grid=(N, ct),
            in_specs=[
                pl.BlockSpec((None, (H + 3) * wp, T), lambda n, j: (n, 0, j)),
                pl.BlockSpec((None, 9, T, T), lambda n, j: (j, 0, 0, 0)),
                pl.BlockSpec((None, 1, T), lambda n, j: (j, 0, 0)),
            ],
            out_specs=pl.BlockSpec((None, h_out, W, T),
                                   lambda n, j: (n, 0, 0, j)),
        ),
        compiler_params=pltpu.CompilerParams(
            dimension_semantics=("parallel", "parallel"),
            vmem_limit_bytes=_VMEM_LIMIT),
    )(xf, w_bd, bias)
    if stride > 1:
        out = out[:, :, ::2, :]
    return out


@jax.jit
def _stem_conv(x, w, bias):
    """7x7 stride-2 pad-3 conv (3 input channels) via im2col + fused matmul."""
    # TODO(synk): move the 7x7 patch extraction into the matmul kernel to drop
    # the XLA-side im2col materialization entirely.
    N, H, W, C = x.shape
    OH = (H + 6 - 7) // 2 + 1
    OW = (W + 6 - 7) // 2 + 1
    xp = jnp.pad(x, ((0, 0), (3, 3), (3, 3), (0, 0)))
    rows = []
    for ky in range(7):
        cols = []
        for kx in range(7):
            cols.append(xp[:, ky:ky + 2 * OH:2, kx:kx + 2 * OW:2, :])
        rows.append(jnp.stack(cols, axis=3))
    patches = jnp.stack(rows, axis=3)                  # (N, OH, OW, 7, 7, 3)
    lhs = patches.reshape(N * OH * OW, 7 * 7 * C)
    kp = w.shape[0]                                    # weight pre-padded K
    if kp != lhs.shape[1]:
        lhs = jnp.pad(lhs, ((0, 0), (0, kp - lhs.shape[1])))
    out = _matmul_bias(lhs, w, bias, None, relu=True, out_dtype=jnp.bfloat16)
    return out.reshape(N, OH, OW, w.shape[1])


@jax.jit
def _maxpool_3x3_s2_p1(x):
    """3x3 / stride-2 / pad-1 maxpool, single pass over the padded input."""
    N, H, W, C = x.shape
    OH = (H - 1) // 2 + 1
    OW = (W - 1) // 2 + 1
    pad_val = float(jnp.finfo(x.dtype).min)
    xp = jnp.pad(x, ((0, 0), (1, 1), (1, 1), (0, 0)), constant_values=pad_val)
    Hp, Wp = H + 2, W + 2                     # even for even H, W
    xr = xp.reshape(N, Hp // 2, 2, Wp // 2, 2 * C)     # column pairs -> lanes
    out = pl.pallas_call(
        _maxpool_kernel,
        out_shape=jax.ShapeDtypeStruct((N, OH, OW, C), x.dtype),
        grid_spec=pltpu.PrefetchScalarGridSpec(
            num_scalar_prefetch=0,
            grid=(N,),
            in_specs=[pl.BlockSpec((None, Hp // 2, 2, Wp // 2, 2 * C),
                                   lambda n: (n, 0, 0, 0, 0))],
            out_specs=pl.BlockSpec((None, OH, OW, C), lambda n: (n, 0, 0, 0)),
        ),
        compiler_params=pltpu.CompilerParams(
            dimension_semantics=("parallel",)),
    )(xr)
    return out


# ------------------------------- model forward ------------------------------

def _bottleneck(x, blk):
    stride = blk['stride']
    if 'wd' in blk:
        identity = conv1x1_bn(x, blk['wd'], blk['bd'], stride=stride,
                              relu=False)
    else:
        identity = x
    out = conv1x1_bn(x, blk['w1'], blk['b1'], relu=True)
    out = _grouped_conv3x3(out, blk['w2'], blk['b2'], stride=stride)
    # residual add + ReLU fused into the third 1x1 conv's epilogue
    out = conv1x1_bn(out, blk['w3'], blk['b3'], relu=True, residual=identity)
    return out


def resnext101_32x8d_forward(x_nchw, params):
    x = jnp.transpose(x_nchw, (0, 2, 3, 1)).astype(jnp.bfloat16)   # NCHW->NHWC
    x = _stem_conv(x, params['conv1_w'], params['conv1_b'])
    x = _maxpool_3x3_s2_p1(x)
    for stage in params['stages']:
        for blk in stage:
            x = _bottleneck(x, blk)
    feat = jnp.mean(x.astype(jnp.float32), axis=(1, 2))            # (N, 2048)
    logits = _matmul_bias(feat, params['fc_w'], params['fc_b'], None,
                          relu=False, out_dtype=jnp.float32)
    return logits                                                  # (N, 20)


# ------------------------------ parameter build ------------------------------

def _bn_affine(c):
    # eval-mode BN with gamma=1, beta=0, running_mean=0, running_var=1
    scale = jnp.full((c,), 1.0 / math.sqrt(1.0 + _BN_EPS), jnp.float32)
    shift = jnp.zeros((c,), jnp.float32)
    return scale, shift


def _fold_1x1(w, scale, shift):
    # (Cout, Cin, 1, 1) -> (Cin, Cout) bf16 with BN scale folded; bias (1,Cout)
    wf = w[:, :, 0, 0] * scale[:, None]
    return wf.T.astype(jnp.bfloat16), shift.reshape(1, -1)


def _fold_stem(w, scale, shift):
    # (64, 3, 7, 7) -> (Kp, 64) bf16, rows ordered (ky, kx, cin), zero-padded to
    # a multiple of 128 so no K padding pass is needed at run time.
    wf = w * scale[:, None, None, None]
    wf = wf.transpose(2, 3, 1, 0).reshape(-1, w.shape[0])
    k = wf.shape[0]
    kp = _round_up(k, 128)
    wf = jnp.pad(wf, ((0, kp - k), (0, 0)))
    return wf.astype(jnp.bfloat16), shift.reshape(1, -1)


def _fold_grouped(w, scale, shift, groups, tile):
    # (Cout, Cg, 3, 3) grouped weights -> lane-dense block-diagonal
    # (Cout//tile, 9, tile, tile) bf16, BN scale folded; bias (Cout//tile,1,tile)
    cout, cg, kh, kw = w.shape
    cout_g = cout // groups
    tile = min(tile, cout)
    assert cout_g == cg and cout % tile == 0 and tile % cout_g == 0
    wf = w * scale[:, None, None, None]
    wg = wf.reshape(groups, cout_g, cg, kh, kw).transpose(0, 3, 4, 2, 1)
    gpt = tile // cout_g                    # groups per lane tile
    ct = cout // tile
    wt = wg.reshape(ct, gpt, kh, kw, cg, cout_g)
    eye = jnp.eye(gpt, dtype=jnp.float32)
    bd = jnp.einsum('taxycd,ab->txyacbd', wt, eye)
    bd = bd.reshape(ct, kh * kw, gpt * cg, gpt * cout_g).astype(jnp.bfloat16)
    return bd, shift.reshape(ct, 1, tile)


def build_params(seed=42):
    # TODO(synk): torchvision pretrained=True checkpoint load is replaced by
    # deterministic synthetic init (shapes identical to resnext101_32x8d).
    key = jax.random.PRNGKey(seed)
    counter = [0]

    def nk():
        counter[0] += 1
        return jax.random.fold_in(key, counter[0])

    def conv_w(cout, cin_g, kh, kw):
        fan_in = cin_g * kh * kw
        return (jax.random.normal(nk(), (cout, cin_g, kh, kw), jnp.float32)
                / math.sqrt(float(fan_in)))

    params = {}
    w = conv_w(64, 3, 7, 7)
    params['conv1_w'], params['conv1_b'] = _fold_stem(w, *_bn_affine(64))

    groups, base_width, expansion = 32, 8, 4
    layers_cfg = [(64, 3, 1), (128, 4, 2), (256, 23, 2), (512, 3, 2)]
    inplanes = 64
    stages = []
    for planes, nblocks, stride in layers_cfg:
        width = planes * base_width // 64 * groups
        outc = planes * expansion
        blocks = []
        for b in range(nblocks):
            s = stride if b == 0 else 1
            blk = {'stride': s}
            blk['w1'], blk['b1'] = _fold_1x1(conv_w(width, inplanes, 1, 1),
                                             *_bn_affine(width))
            blk['w2'], blk['b2'] = _fold_grouped(
                conv_w(width, width // groups, 3, 3), *_bn_affine(width),
                groups=groups, tile=_GCONV_TILE)
            blk['w3'], blk['b3'] = _fold_1x1(conv_w(outc, width, 1, 1),
                                             *_bn_affine(outc))
            if b == 0 and (s != 1 or inplanes != outc):
                blk['wd'], blk['bd'] = _fold_1x1(conv_w(outc, inplanes, 1, 1),
                                                 *_bn_affine(outc))
            blocks.append(blk)
            inplanes = outc
        stages.append(blocks)
    params['stages'] = stages

    params['fc_w'] = (jax.random.normal(nk(), (inplanes, _NCLASSES),
                                        jnp.float32)
                      / math.sqrt(float(inplanes))).astype(jnp.bfloat16)
    params['fc_b'] = jnp.zeros((1, _NCLASSES), jnp.float32)
    return params


# ---------------------------------- main ------------------------------------

if __name__ == "__main__":
    params = build_params(seed=42)
    x = jax.random.normal(jax.random.PRNGKey(0), (2, 3, 32, 32), jnp.float32)
    logits = resnext101_32x8d_forward(x, params)
    logits = jax.block_until_ready(logits)
    assert logits.shape == (2, _NCLASSES)
    assert logits.dtype == jnp.float32
    assert bool(jnp.all(jnp.isfinite(logits)))
    print("KERNEL_OK")
</pallas_src>

<mosaic_0001>
module attributes {stable_mosaic.version = 11 : i64} {
  func.func @_mm_bias_kernel(%arg0: i32, %arg1: i32, %arg2: memref<512x256xbf16, #tpu.memory_space<vmem>>, %arg3: memref<256x64xbf16, #tpu.memory_space<vmem>>, %arg4: memref<1x64xf32, #tpu.memory_space<vmem>>, %arg5: memref<512x64xbf16, #tpu.memory_space<vmem>>) attributes {dimension_semantics = [#tpu.dimension_semantics<parallel>, #tpu.dimension_semantics<parallel>], iteration_bounds = array<i64: 1, 1>, scalar_prefetch = 0 : i64, scratch_operands = 0 : i64, tpu.core_type = #tpu.core_type<tc>, window_params = [{transform_indices = @transform_0, window_bounds = array<i64: 512, 256>}, {transform_indices = @transform_1, window_bounds = array<i64: 256, 64>}, {transform_indices = @transform_2, window_bounds = array<i64: 1, 64>}, {transform_indices = @transform_3, window_bounds = array<i64: 512, 64>}]} {
    %c0 = arith.constant 0 : index
    %c0_0 = arith.constant 0 : index
    %0 = vector.load %arg2[%c0, %c0_0] : memref<512x256xbf16, #tpu.memory_space<vmem>>, vector<512x256xbf16>
    %c0_1 = arith.constant 0 : index
    %c0_2 = arith.constant 0 : index
    %1 = vector.load %arg3[%c0_1, %c0_2] : memref<256x64xbf16, #tpu.memory_space<vmem>>, vector<256x64xbf16>
    %cst = arith.constant dense<0.000000e+00> : vector<512x64xf32>
    %2 = tpu.matmul %0, %1, %cst {dimension_numbers = #tpu.dot_dimension_numbers<[1], [0], [0], [1], [0, 0, 1, 1], [], []>} : vector<512x256xbf16>, vector<256x64xbf16>, vector<512x64xf32> -> vector<512x64xf32>
    %c0_3 = arith.constant 0 : index
    %c0_4 = arith.constant 0 : index
    %3 = vector.load %arg4[%c0_3, %c0_4] : memref<1x64xf32, #tpu.memory_space<vmem>>, vector<1x64xf32>
    %4 = vector.broadcast %3 : vector<1x64xf32> to vector<512x64xf32>
    %5 = arith.addf %2, %4 : vector<512x64xf32>
    %cst_5 = arith.constant 0.000000e+00 : f32
    %6 = vector.broadcast %cst_5 : f32 to vector<512x64xf32>
    %7 = arith.maximumf %5, %6 : vector<512x64xf32>
    %8 = arith.truncf %7 : vector<512x64xf32> to vector<512x64xbf16>
    %c0_6 = arith.constant 0 : index
    %c0_7 = arith.constant 0 : index
    %9 = vector.load %arg5[%c0_6, %c0_7] : memref<512x64xbf16, #tpu.memory_space<vmem>>, vector<512x64xbf16>
    tpu.vector_store %arg5[%c0_6, %c0_7], %8 {strides = array<i32>} : memref<512x64xbf16, #tpu.memory_space<vmem>>, vector<512x64xbf16>,
    return
  }
  func.func @transform_0(%arg0: i32, %arg1: i32) -> (i32, i32) {
    %c0_i32 = arith.constant 0 : i32
    %c0_i32_0 = arith.constant 0 : i32
    return %arg0, %c0_i32 : i32, i32
  }
  func.func @transform_1(%arg0: i32, %arg1: i32) -> (i32, i32) {
    %c0_i32 = arith.constant 0 : i32
    %c0_i32_0 = arith.constant 0 : i32
    return %c0_i32, %arg1 : i32, i32
  }
  func.func @transform_2(%arg0: i32, %arg1: i32) -> (i32, i32) {
    %c0_i32 = arith.constant 0 : i32
    %c0_i32_0 = arith.constant 0 : i32
    return %c0_i32, %arg1 : i32, i32
  }
  func.func @transform_3(%arg0: i32, %arg1: i32) -> (i32, i32) {
    %c0_i32 = arith.constant 0 : i32
    return %arg0, %arg1 : i32, i32
  }
}

</mosaic_0001>

<bundles_post_ra>
// kernel: _matmul_bias.1
= control target key start
LH: loop header
LB: loop body
LE: loop exit
PB: predicated region body
PF: predicated region fallthrough
CT: control target
= control target key end

     0   :  { %8 = vsyncpa [#allocation3], 0  ;;  %s1608_s12 = smov [#allocation2]   ;;  %s2049_s0 = inlined_call_operand.hbm [shape: bf16[512,256], index: 0, kind: input, shape index: {}]   ;;  %s2050_s1 = inlined_call_operand.vmem [shape: bf16[256,64], index: 1, kind: input, shape index: {}]   ;;  %s2051_s2 = inlined_call_operand.vmem [shape: f32[1,64], index: 2, kind: input, shape index: {}]   ;;  %s2052_s3 = inlined_call_operand.vmem [shape: bf16[512,64], index: 3, kind: output, shape index: {}]  }
   0x1   :  { %s14_s13 = sshll.u32 %s1608_s12, 4  ;;  %s1584_s16 = scalar_lea.hbm %s2049_s0, 8192  ;;  %s15_s13 = int_to_ptr.vmem [resolvable:$true] %s14_s13 }
   0x2   :  { %p1585_p0 = scmp.ne.s32.totalorder %s2049_s0, %s1584_s16  ;;  %p1588_p1 = scmp.lt.u32.totalorder %s1584_s16, %s2049_s0 }
   0x4   :  { %p1590_p2 = pnand %p1588_p1, %p1585_p0 }
   0x6   :  { %1593 = shalt.err (!%p1590_p2)
}
   0x7   :  { %s1594_s21 = scalar_lea.vmem %s15_s13, 8192  ;;  %p1599_p4 = scmp.lt.s32.totalorder %s15_s13, %s15_s13 }
   0x8   :  { %p1595_p3 = scmp.ne.s32.totalorder %s15_s13, %s1594_s21  ;;  %p1600_p5 = scmp.lt.s32.totalorder %s1594_s21, %s1594_s21 }
   0xa   :  { %p1601_p6 = por %p1600_p5, %p1599_p4 }
   0xc   :  { %p1602_p7 = pnand %p1601_p6, %p1595_p3 }
   0xe   :  { %1605 = shalt.err (!%p1602_p7)
}
   0xf   :  { %s1609_s22 = smov 128   ;;  %s1610_s23 = smov 8  }
  0x10   :  { %20 = dma.hbm_to_vmem [thread:$0]  %s2049_s0, 8192, %s15_s13, [#allocation3], %s1609_s22, %s1609_s22, %s1610_s23  }
  0x11   :  { %1606 = dma.done.wait [#allocation3], 8192  }
  0x12   :  { %1607 = vsyncadd [#allocation3], 4294959104  ;;  %v1611_v0 = vmov 0   ;;  %v1472_v1 = vld [vmem:[%s2050_s1] sm:$0xff]   ;;  %v1473_v2 = vld [vmem:[%s2050_s1 + $0x8] sm:$0xff]   ;;  %vm1157_vm0 = vcmask 519168  }
  0x13   :  { %548 = vmatprep.subr.bf16.mxu0 %v1611_v0  ;;  %1436 = vmatprep.subr.bf16.mxu1 %v1611_v0  ;;  %v1474_v3 = vld [vmem:[%s2050_s1 + $0x10] sm:$0xff]   ;;  %v1475_v4 = vld [vmem:[%s2050_s1 + $0x18] sm:$0xff]   ;;  %v1476_v5 = vld [vmem:[%s2050_s1 + $0x20] sm:$0xff]  }
  0x14   :  { %549 = vmatpush1.bf16.msra.mxu0 %v1472_v1  ;;  %1452 = vmatpush1.bf16.msra.mxu1 %v1472_v1  ;;  %v1490_v6 = vld [vmem:[#allocation2 + $0x4] ss:$8 sps:$4 sm:$0xff]   ;;  %v1478_v9 = vld [vmem:[%s2050_s1 + $0x30] sm:$0xff]   ;;  %v1479_v10 = vld [vmem:[%s2050_s1 + $0x38] sm:$0xff]  }
  0x15   :  { %550 = vmatprep.subr.bf16.mxu0 %v1611_v0  ;;  %1437 = vmatprep.subr.bf16.mxu1 %v1611_v0  ;;  %v1477_v7 = vld [vmem:[%s2050_s1 + $0x28] sm:$0xff]   ;;  %v1480_v11 = vld [vmem:[%s2050_s1 + $0x40] sm:$0xff]   ;;  %v1482_v13 = vld [vmem:[%s2050_s1 + $0x50] sm:$0xff]  }
  0x16   :  { %v1493_v8 = vld [vmem:[#allocation2 + $0x104] ss:$8 sps:$4 sm:$0xff]   ;;  %580 = vmatprep.mubr.bf16.mxu0 %v1490_v6  ;;  %v1483_v14 = vld [vmem:[%s2050_s1 + $0x58] sm:$0xff]   ;;  %v1486_v17 = vld [vmem:[%s2050_s1 + $0x70] sm:$0xff]  }
  0x17   :  { %708 = vmatprep.mubr.bf16.mxu1 %v1493_v8  ;;  %v1481_v12 = vld [vmem:[%s2050_s1 + $0x48] sm:$0xff]   ;;  %v1484_v15 = vld [vmem:[%s2050_s1 + $0x60] sm:$0xff]   ;;  %v1487_v18 = vld [vmem:[%s2050_s1 + $0x78] sm:$0xff]  }
  0x18   :  { %551 = vmatpush1.bf16.msra.mxu0 %v1473_v2  ;;  %1453 = vmatpush1.bf16.msra.mxu1 %v1473_v2  ;;  %v1485_v16 = vld [vmem:[%s2050_s1 + $0x68] sm:$0xff]   ;;  %v1494_v21 = vld [vmem:[#allocation2 + $0x14] ss:$8 sps:$4 sm:$0xff]   ;;  %v1498_v23 = vld [vmem:[#allocation2 + $0x10] ss:$8 sps:$4 sm:$0xff]  }
  0x19   :  { %552 = vmatprep.subr.bf16.mxu0 %v1611_v0  ;;  %1438 = vmatprep.subr.bf16.mxu1 %v1611_v0  ;;  %v1488_v19 = vld [vmem:[#allocation2] ss:$8 sps:$4 sm:$0xff]   ;;  %v1496_v22 = vld [vmem:[#allocation2 + $0x114] ss:$8 sps:$4 sm:$0xff]   ;;  %v1499_v24 = vld [vmem:[#allocation2 + $0x110] ss:$8 sps:$4 sm:$0xff]  }
  0x1a   :  { %v1491_v20 = vld [vmem:[#allocation2 + $0x100] ss:$8 sps:$4 sm:$0xff]   ;;  %v1500_v25 = vld [vmem:[#allocation2 + $0x24] ss:$8 sps:$4 sm:$0xff]   ;;  %v1506_v29 = vld [vmem:[#allocation2 + $0x34] ss:$8 sps:$4 sm:$0xff]  }
  0x1b   :  { %v1502_v26 = vld [vmem:[#allocation2 + $0x124] ss:$8 sps:$4 sm:$0xff]   ;;  %v1504_v27 = vld [vmem:[#allocation2 + $0x20] ss:$8 sps:$4 sm:$0xff]   ;;  %v1508_v30 = vld [vmem:[#allocation2 + $0x134] ss:$8 sps:$4 sm:$0xff]  }
  0x1c   :  { %553 = vmatpush1.bf16.msra.mxu0 %v1474_v3  ;;  %1454 = vmatpush1.bf16.msra.mxu1 %v1474_v3  ;;  %v1505_v28 = vld [vmem:[#allocation2 + $0x120] ss:$8 sps:$4 sm:$0xff]   ;;  %v1510_v31 = vld [vmem:[#allocation2 + $0x30] ss:$8 sps:$4 sm:$0xff]   ;;  %v1512_v33 = vld [vmem:[#allocation2 + $0x44] ss:$8 sps:$4 sm:$0xff]  }
  0x1d   :  { %554 = vmatprep.subr.bf16.mxu0 %v1611_v0  ;;  %1439 = vmatprep.subr.bf16.mxu1 %v1611_v0  ;;  %v1511_v32 = vld [vmem:[#allocation2 + $0x130] ss:$8 sps:$4 sm:$0xff]   ;;  %v1514_v34 = vld [vmem:[#allocation2 + $0x144] ss:$8 sps:$4 sm:$0xff]   ;;  %v1516_v35 = vld [vmem:[#allocation2 + $0x40] ss:$8 sps:$4 sm:$0xff]  }
  0x1e   :  { %v1517_v36 = vld [vmem:[#allocation2 + $0x140] ss:$8 sps:$4 sm:$0xff]   ;;  %v1518_v37 = vld [vmem:[#allocation2 + $0x54] ss:$8 sps:$4 sm:$0xff]   ;;  %v1522_v39 = vld [vmem:[#allocation2 + $0x50] ss:$8 sps:$4 sm:$0xff]  }
  0x1f   :  { %v1520_v38 = vld [vmem:[#allocation2 + $0x154] ss:$8 sps:$4 sm:$0xff]   ;;  %v1523_v40 = vld [vmem:[#allocation2 + $0x150] ss:$8 sps:$4 sm:$0xff]   ;;  %v1524_v41 = vld [vmem:[#allocation2 + $0x64] ss:$8 sps:$4 sm:$0xff]  }
  0x20   :  { %555 = vmatpush1.bf16.msra.mxu0 %v1475_v4  ;;  %1455 = vmatpush1.bf16.msra.mxu1 %v1475_v4  ;;  %v1526_v42 = vld [vmem:[#allocation2 + $0x164] ss:$8 sps:$4 sm:$0xff]   ;;  %v1528_v43 = vld [vmem:[#allocation2 + $0x60] ss:$8 sps:$4 sm:$0xff]   ;;  %v1530_v45 = vld [vmem:[#allocation2 + $0x74] ss:$8 sps:$4 sm:$0xff]  }
  0x21   :  { %556 = vmatprep.subr.bf16.mxu0 %v1611_v0  ;;  %1440 = vmatprep.subr.bf16.mxu1 %v1611_v0  ;;  %v1529_v44 = vld [vmem:[#allocation2 + $0x160] ss:$8 sps:$4 sm:$0xff]   ;;  %v1532_v46 = vld [vmem:[#allocation2 + $0x174] ss:$8 sps:$4 sm:$0xff]   ;;  %v1534_v47 = vld [vmem:[#allocation2 + $0x70] ss:$8 sps:$4 sm:$0xff]  }
  0x22   :  { %v1535_v48 = vld [vmem:[#allocation2 + $0x170] ss:$8 sps:$4 sm:$0xff]   ;;  %v1536_v49 = vld [vmem:[#allocation2 + $0x84] ss:$8 sps:$4 sm:$0xff]   ;;  %v1540_v51 = vld [vmem:[#allocation2 + $0x80] ss:$8 sps:$4 sm:$0xff]  }
  0x23   :  { %v1538_v50 = vld [vmem:[#allocation2 + $0x184] ss:$8 sps:$4 sm:$0xff]   ;;  %v1541_v52 = vld [vmem:[#allocation2 + $0x180] ss:$8 sps:$4 sm:$0xff]   ;;  %v1542_v53 = vld [vmem:[#allocation2 + $0x94] ss:$8 sps:$4 sm:$0xff]  }
  0x24   :  { %557 = vmatpush1.bf16.msra.mxu0 %v1476_v5  ;;  %1456 = vmatpush1.bf16.msra.mxu1 %v1476_v5  ;;  %v1544_v54 = vld [vmem:[#allocation2 + $0x194] ss:$8 sps:$4 sm:$0xff]   ;;  %v1546_v55 = vld [vmem:[#allocation2 + $0x90] ss:$8 sps:$4 sm:$0xff]   ;;  %v1548_v57 = vld [vmem:[#allocation2 + $0xa4] ss:$8 sps:$4 sm:$0xff]  }
  0x25   :  { %558 = vmatprep.subr.bf16.mxu0 %v1611_v0  ;;  %1441 = vmatprep.subr.bf16.mxu1 %v1611_v0  ;;  %v1547_v56 = vld [vmem:[#allocation2 + $0x190] ss:$8 sps:$4 sm:$0xff]   ;;  %v1550_v58 = vld [vmem:[#allocation2 + $0x1a4] ss:$8 sps:$4 sm:$0xff]   ;;  %v1552_v59 = vld [vmem:[#allocation2 + $0xa0] ss:$8 sps:$4 sm:$0xff]  }
  0x26   :  { %v1553_v60 = vld [vmem:[#allocation2 + $0x1a0] ss:$8 sps:$4 sm:$0xff]   ;;  %v1554_v61 = vld [vmem:[#allocation2 + $0xb4] ss:$8 sps:$4 sm:$0xff]   ;;  %v1558_v63 = vld [vmem:[#allocation2 + $0xb0] ss:$8 sps:$4 sm:$0xff]  }
  0x27   :  { %v1556_v62 = vld [vmem:[#allocation2 + $0x1b4] ss:$8 sps:$4 sm:$0xff]   ;;  %v1560_v1 = vld [vmem:[#allocation2 + $0xc4] ss:$8 sps:$4 sm:$0xff]   ;;  %v1564_v3 = vld [vmem:[#allocation2 + $0xc0] ss:$8 sps:$4 sm:$0xff]  }
  0x28   :  { %559 = vmatpush1.bf16.msra.mxu0 %v1477_v7  ;;  %1457 = vmatpush1.bf16.msra.mxu1 %v1477_v7  ;;  %v1562_v2 = vld [vmem:[#allocation2 + $0x1c4] ss:$8 sps:$4 sm:$0xff]   ;;  %v1565_v4 = vld [vmem:[#allocation2 + $0x1c0] ss:$8 sps:$4 sm:$0xff]   ;;  %v1566_v5 = vld [vmem:[#allocation2 + $0xd4] ss:$8 sps:$4 sm:$0xff]  }
  0x29   :  { %560 = vmatprep.subr.bf16.mxu0 %v1611_v0  ;;  %1442 = vmatprep.subr.bf16.mxu1 %v1611_v0  ;;  %v1568_v6 = vld [vmem:[#allocation2 + $0x1d4] ss:$8 sps:$4 sm:$0xff]   ;;  %v1570_v7 = vld [vmem:[#allocation2 + $0xd0] ss:$8 sps:$4 sm:$0xff]  }
  0x2a   :  { %v1571_v8 = vld [vmem:[#allocation2 + $0x1d0] ss:$8 sps:$4 sm:$0xff]  }
  0x2c   :  { %561 = vmatpush1.bf16.msra.mxu0 %v1478_v9  ;;  %1458 = vmatpush1.bf16.msra.mxu1 %v1478_v9  ;;  %v1572_v9 = vld [vmem:[#allocation2 + $0xe4] ss:$8 sps:$4 sm:$0xff]  }
  0x2d   :  { %562 = vmatprep.subr.bf16.mxu0 %v1611_v0  ;;  %1443 = vmatprep.subr.bf16.mxu1 %v1611_v0 }
  0x30   :  { %563 = vmatpush1.bf16.msra.mxu0 %v1479_v10  ;;  %1459 = vmatpush1.bf16.msra.mxu1 %v1479_v10  ;;  %v1574_v10 = vld [vmem:[#allocation2 + $0x1e4] ss:$8 sps:$4 sm:$0xff]  }
  0x31   :  { %564 = vmatprep.subr.bf16.mxu0 %v1611_v0  ;;  %1444 = vmatprep.subr.bf16.mxu1 %v1611_v0 }
  0x34   :  { %565 = vmatpush1.bf16.msra.mxu0 %v1480_v11  ;;  %1460 = vmatpush1.bf16.msra.mxu1 %v1480_v11  ;;  %v1576_v11 = vld [vmem:[#allocation2 + $0xe0] ss:$8 sps:$4 sm:$0xff]  }
  0x35   :  { %566 = vmatprep.subr.bf16.mxu0 %v1611_v0  ;;  %1445 = vmatprep.subr.bf16.mxu1 %v1611_v0 }
  0x38   :  { %567 = vmatpush1.bf16.msra.mxu0 %v1481_v12  ;;  %1461 = vmatpush1.bf16.msra.mxu1 %v1481_v12  ;;  %v1577_v12 = vld [vmem:[#allocation2 + $0x1e0] ss:$8 sps:$4 sm:$0xff]  }
  0x39   :  { %568 = vmatprep.subr.bf16.mxu0 %v1611_v0  ;;  %1446 = vmatprep.subr.bf16.mxu1 %v1611_v0 }
  0x3c   :  { %569 = vmatpush1.bf16.msra.mxu0 %v1482_v13  ;;  %1462 = vmatpush1.bf16.msra.mxu1 %v1482_v13  ;;  %v1578_v13 = vld [vmem:[#allocation2 + $0xf4] ss:$8 sps:$4 sm:$0xff]  }
  0x3d   :  { %570 = vmatprep.subr.bf16.mxu0 %v1611_v0  ;;  %1447 = vmatprep.subr.bf16.mxu1 %v1611_v0 }
  0x40   :  { %571 = vmatpush1.bf16.msra.mxu0 %v1483_v14  ;;  %1463 = vmatpush1.bf16.msra.mxu1 %v1483_v14  ;;  %v1580_v14 = vld [vmem:[#allocation2 + $0x1f4] ss:$8 sps:$4 sm:$0xff]  }
  0x41   :  { %572 = vmatprep.subr.bf16.mxu0 %v1611_v0  ;;  %1448 = vmatprep.subr.bf16.mxu1 %v1611_v0 }
  0x44   :  { %573 = vmatpush1.bf16.msra.mxu0 %v1484_v15  ;;  %1464 = vmatpush1.bf16.msra.mxu1 %v1484_v15  ;;  %v1582_v15 = vld [vmem:[#allocation2 + $0xf0] ss:$8 sps:$4 sm:$0xff]  }
  0x45   :  { %574 = vmatprep.subr.bf16.mxu0 %v1611_v0  ;;  %1449 = vmatprep.subr.bf16.mxu1 %v1611_v0 }
  0x48   :  { %575 = vmatpush1.bf16.msra.mxu0 %v1485_v16  ;;  %1465 = vmatpush1.bf16.msra.mxu1 %v1485_v16  ;;  %v1583_v16 = vld [vmem:[#allocation2 + $0x1f0] ss:$8 sps:$4 sm:$0xff]  }
  0x49   :  { %576 = vmatprep.subr.bf16.mxu0 %v1611_v0  ;;  %1450 = vmatprep.subr.bf16.mxu1 %v1611_v0 }
  0x4c   :  { %577 = vmatpush1.bf16.msra.mxu0 %v1486_v17  ;;  %1466 = vmatpush1.bf16.msra.mxu1 %v1486_v17  ;;  %v1727_v17 = vld [vmem:[%s2051_s2] ss:$0 sm:$0xff] }
  0x4d   :  { %578 = vmatprep.subr.bf16.mxu0 %v1611_v0  ;;  %1451 = vmatprep.subr.bf16.mxu1 %v1611_v0  ;;  %v1559_v0 = vld [vmem:[#allocation2 + $0x1b0] ss:$8 sps:$4 sm:$0xff]  }
  0x50   :  { %579 = vmatpush1.bf16.msra.mxu0 %v1487_v18  ;;  %1467 = vmatpush1.bf16.msra.mxu1 %v1487_v18 }
  0x53   :  { %581 = vmatmul.mubr.bf16.vlgmr.msra.gmra.mrb[0].mxu0 %v1488_v19  ;;  %709 = vmatmul.mubr.bf16.vlgmr.msra.gmra.mrb[0].mxu1 %v1491_v20 }
  0x54   :  { %588 = vmatprep.mubr.bf16.mxu0 %v1494_v21  ;;  %716 = vmatprep.mubr.bf16.mxu1 %v1496_v22 }
  0x5b   :  { %589 = vmatmul.mubr.bf16.gmra.mrb[4].mxu0 %v1498_v23  ;;  %717 = vmatmul.mubr.bf16.gmra.mrb[4].mxu1 %v1499_v24 }
  0x5c   :  { %596 = vmatprep.mubr.bf16.mxu0 %v1500_v25  ;;  %724 = vmatprep.mubr.bf16.mxu1 %v1502_v26 }
  0x63   :  { %597 = vmatmul.mubr.bf16.gmra.mrb[8].mxu0 %v1504_v27  ;;  %725 = vmatmul.mubr.bf16.gmra.mrb[8].mxu1 %v1505_v28 }
  0x64   :  { %604 = vmatprep.mubr.bf16.mxu0 %v1506_v29  ;;  %732 = vmatprep.mubr.bf16.mxu1 %v1508_v30 }
  0x6b   :  { %605 = vmatmul.mubr.bf16.gmra.mrb[12].mxu0 %v1510_v31  ;;  %733 = vmatmul.mubr.bf16.gmra.mrb[12].mxu1 %v1511_v32 }
  0x6c   :  { %612 = vmatprep.mubr.bf16.mxu0 %v1512_v33  ;;  %740 = vmatprep.mubr.bf16.mxu1 %v1514_v34 }
  0x73   :  { %613 = vmatmul.mubr.bf16.gmra.mrb[16].mxu0 %v1516_v35  ;;  %741 = vmatmul.mubr.bf16.gmra.mrb[16].mxu1 %v1517_v36 }
  0x74   :  { %620 = vmatprep.mubr.bf16.mxu0 %v1518_v37  ;;  %748 = vmatprep.mubr.bf16.mxu1 %v1520_v38 }
  0x7b   :  { %621 = vmatmul.mubr.bf16.gmra.mrb[20].mxu0 %v1522_v39  ;;  %749 = vmatmul.mubr.bf16.gmra.mrb[20].mxu1 %v1523_v40 }
  0x7c   :  { %628 = vmatprep.mubr.bf16.mxu0 %v1524_v41  ;;  %756 = vmatprep.mubr.bf16.mxu1 %v1526_v42 }
  0x83   :  { %629 = vmatmul.mubr.bf16.gmra.mrb[24].mxu0 %v1528_v43  ;;  %757 = vmatmul.mubr.bf16.gmra.mrb[24].mxu1 %v1529_v44 }
  0x84   :  { %636 = vmatprep.mubr.bf16.mxu0 %v1530_v45  ;;  %764 = vmatprep.mubr.bf16.mxu1 %v1532_v46 }
  0x8b   :  { %637 = vmatmul.mubr.bf16.gmra.mrb[28].mxu0 %v1534_v47  ;;  %765 = vmatmul.mubr.bf16.gmra.mrb[28].mxu1 %v1535_v48 }
  0x8c   :  { %644 = vmatprep.mubr.bf16.mxu0 %v1536_v49  ;;  %772 = vmatprep.mubr.bf16.mxu1 %v1538_v50 }
  0x93   :  { %645 = vmatmul.mubr.bf16.gmra.mrb[32].mxu0 %v1540_v51  ;;  %773 = vmatmul.mubr.bf16.gmra.mrb[32].mxu1 %v1541_v52 }
  0x94   :  { %652 = vmatprep.mubr.bf16.mxu0 %v1542_v53  ;;  %780 = vmatprep.mubr.bf16.mxu1 %v1544_v54 }
  0x9b   :  { %653 = vmatmul.mubr.bf16.gmra.mrb[36].mxu0 %v1546_v55  ;;  %781 = vmatmul.mubr.bf16.gmra.mrb[36].mxu1 %v1547_v56 }
  0x9c   :  { %660 = vmatprep.mubr.bf16.mxu0 %v1548_v57  ;;  %788 = vmatprep.mubr.bf16.mxu1 %v1550_v58 }
  0xa3   :  { %661 = vmatmul.mubr.bf16.gmra.mrb[40].mxu0 %v1552_v59  ;;  %789 = vmatmul.mubr.bf16.gmra.mrb[40].mxu1 %v1553_v60 }
  0xa4   :  { %668 = vmatprep.mubr.bf16.mxu0 %v1554_v61  ;;  %796 = vmatprep.mubr.bf16.mxu1 %v1556_v62 }
  0xab   :  { %669 = vmatmul.mubr.bf16.gmra.mrb[44].mxu0 %v1558_v63  ;;  %797 = vmatmul.mubr.bf16.gmra.mrb[44].mxu1 %v1559_v0 }
  0xac   :  { %676 = vmatprep.mubr.bf16.mxu0 %v1560_v1  ;;  %804 = vmatprep.mubr.bf16.mxu1 %v1562_v2 }
  0xb3   :  { %677 = vmatmul.mubr.bf16.gmra.mrb[48].mxu0 %v1564_v3  ;;  %805 = vmatmul.mubr.bf16.gmra.mrb[48].mxu1 %v1565_v4 }
  0xb4   :  { %684 = vmatprep.mubr.bf16.mxu0 %v1566_v5  ;;  %812 = vmatprep.mubr.bf16.mxu1 %v1568_v6 }
  0xbb   :  { %685 = vmatmul.mubr.bf16.gmra.mrb[52].mxu0 %v1570_v7  ;;  %813 = vmatmul.mubr.bf16.gmra.mrb[52].mxu1 %v1571_v8 }
  0xbc   :  { %692 = vmatprep.mubr.bf16.mxu0 %v1572_v9  ;;  %820 = vmatprep.mubr.bf16.mxu1 %v1574_v10 }
  0xc3   :  { %693 = vmatmul.mubr.bf16.gmra.mrb[56].mxu0 %v1576_v11  ;;  %821 = vmatmul.mubr.bf16.gmra.mrb[56].mxu1 %v1577_v12 }
  0xc4   :  { %700 = vmatprep.mubr.bf16.mxu0 %v1578_v13  ;;  %828 = vmatprep.mubr.bf16.mxu1 %v1580_v14 }
  0xcb   :  { %701 = vmatmul.mubr.bf16.gmra.mrb[60].mxu0 %v1582_v15  ;;  %829 = vmatmul.mubr.bf16.gmra.mrb[60].mxu1 %v1583_v16 }
 0x126   :  { %v582_v18 = vpop.f32.mrb[0].mxu0  ;;  %v710_v19 = vpop.f32.mrb[0].mxu1 }
 0x127   :  { %v583_v20 = vadd.f32 %v1727_v17, %v582_v18  ;;  %v711_v21 = vadd.f32 %v1727_v17, %v710_v19  ;;  %v584_v22 = vpop.f32.mrb[1].mxu0  ;;  %v712_v23 = vpop.f32.mrb[1].mxu1 }
 0x128   :  { %v585_v24 = vpop.f32.mrb[2].mxu0  ;;  %v713_v25 = vpop.f32.mrb[2].mxu1 }
 0x129   :  { %v837_v26 = vmax.f32 %v583_v20, 0.0  ;;  %v869_v27 = vmax.f32 %v711_v21, 0.0  ;;  %v586_v28 = vadd.f32 %v1727_v17, %v585_v24  ;;  %v714_v29 = vadd.f32 %v1727_v17, %v713_v25  ;;  %v587_v30 = vpop.f32.mrb[3].mxu0  ;;  %v715_v31 = vpop.f32.mrb[3].mxu1 }
 0x12b   :  { %v1372_v32 = vpack.c.bf16 %v837_v26, %v837_v26  ;;  %v1404_v33 = vpack.c.bf16 %v869_v27, %v869_v27  ;;  %v838_v34 = vmax.f32 %v586_v28, 0.0  ;;  %v870_v35 = vmax.f32 %v714_v29, 0.0 }
 0x12d   :  { %1158 = vst.msk [vmem:[%s2052_s3] sm:$0xf] %vm1157_vm0, %v1372_v32  ;;  %1190 = vst.msk [vmem:[%s2052_s3 + $0x80] sm:$0xf] %vm1157_vm0, %v1404_v33  ;;  %v1373_v36 = vpack.c.bf16 %v838_v34, %v838_v34  ;;  %v1405_v37 = vpack.c.bf16 %v870_v35, %v870_v35 }
 0x12e   :  { %v590_v38 = vpop.f32.mrb[4].mxu0  ;;  %v718_v39 = vpop.f32.mrb[4].mxu1 }
 0x12f   :  { %1159 = vst.msk [vmem:[%s2052_s3 + $0x4] sm:$0xf] %vm1157_vm0, %v1373_v36  ;;  %1191 = vst.msk [vmem:[%s2052_s3 + $0x84] sm:$0xf] %vm1157_vm0, %v1405_v37  ;;  %v591_v40 = vadd.f32 %v1727_v17, %v590_v38  ;;  %v719_v41 = vadd.f32 %v1727_v17, %v718_v39  ;;  %v592_v42 = vpop.f32.mrb[5].mxu0  ;;  %v720_v43 = vpop.f32.mrb[5].mxu1 }
 0x130   :  { %v593_v44 = vpop.f32.mrb[6].mxu0  ;;  %v721_v45 = vpop.f32.mrb[6].mxu1 }
 0x131   :  { %v839_v46 = vmax.f32 %v591_v40, 0.0  ;;  %v871_v47 = vmax.f32 %v719_v41, 0.0  ;;  %v594_v48 = vadd.f32 %v1727_v17, %v593_v44  ;;  %v722_v49 = vadd.f32 %v1727_v17, %v721_v45  ;;  %v595_v50 = vpop.f32.mrb[7].mxu0  ;;  %v723_v51 = vpop.f32.mrb[7].mxu1 }
 0x133   :  { %v1374_v52 = vpack.c.bf16 %v839_v46, %v839_v46  ;;  %v1406_v53 = vpack.c.bf16 %v871_v47, %v871_v47  ;;  %v840_v54 = vmax.f32 %v594_v48, 0.0  ;;  %v872_v55 = vmax.f32 %v722_v49, 0.0 }
 0x135   :  { %1160 = vst.msk [vmem:[%s2052_s3 + $0x8] sm:$0xf] %vm1157_vm0, %v1374_v52  ;;  %1192 = vst.msk [vmem:[%s2052_s3 + $0x88] sm:$0xf] %vm1157_vm0, %v1406_v53  ;;  %v1375_v56 = vpack.c.bf16 %v840_v54, %v840_v54  ;;  %v1407_v57 = vpack.c.bf16 %v872_v55, %v872_v55 }
 0x136   :  { %v598_v58 = vpop.f32.mrb[8].mxu0  ;;  %v726_v59 = vpop.f32.mrb[8].mxu1 }
 0x137   :  { %1161 = vst.msk [vmem:[%s2052_s3 + $0xc] sm:$0xf] %vm1157_vm0, %v1375_v56  ;;  %1193 = vst.msk [vmem:[%s2052_s3 + $0x8c] sm:$0xf] %vm1157_vm0, %v1407_v57  ;;  %v599_v60 = vadd.f32 %v1727_v17, %v598_v58  ;;  %v727_v61 = vadd.f32 %v1727_v17, %v726_v59  ;;  %v600_v62 = vpop.f32.mrb[9].mxu0  ;;  %v728_v63 = vpop.f32.mrb[9].mxu1 }
 0x138   :  { %v601_v0 = vpop.f32.mrb[10].mxu0  ;;  %v729_v1 = vpop.f32.mrb[10].mxu1 }
 0x139   :  { %v841_v2 = vmax.f32 %v599_v60, 0.0  ;;  %v873_v3 = vmax.f32 %v727_v61, 0.0  ;;  %v602_v4 = vadd.f32 %v1727_v17, %v601_v0  ;;  %v730_v5 = vadd.f32 %v1727_v17, %v729_v1  ;;  %v603_v6 = vpop.f32.mrb[11].mxu0  ;;  %v731_v7 = vpop.f32.mrb[11].mxu1 }
 0x13b   :  { %v1376_v8 = vpack.c.bf16 %v841_v2, %v841_v2  ;;  %v1408_v9 = vpack.c.bf16 %v873_v3, %v873_v3  ;;  %v842_v10 = vmax.f32 %v602_v4, 0.0  ;;  %v874_v11 = vmax.f32 %v730_v5, 0.0 }
 0x13d   :  { %1162 = vst.msk [vmem:[%s2052_s3 + $0x10] sm:$0xf] %vm1157_vm0, %v1376_v8  ;;  %1194 = vst.msk [vmem:[%s2052_s3 + $0x90] sm:$0xf] %vm1157_vm0, %v1408_v9  ;;  %v1377_v12 = vpack.c.bf16 %v842_v10, %v842_v10  ;;  %v1409_v13 = vpack.c.bf16 %v874_v11, %v874_v11 }
 0x13e   :  { %v606_v14 = vpop.f32.mrb[12].mxu0  ;;  %v734_v15 = vpop.f32.mrb[12].mxu1 }
 0x13f   :  { %1163 = vst.msk [vmem:[%s2052_s3 + $0x14] sm:$0xf] %vm1157_vm0, %v1377_v12  ;;  %1195 = vst.msk [vmem:[%s2052_s3 + $0x94] sm:$0xf] %vm1157_vm0, %v1409_v13  ;;  %v607_v16 = vadd.f32 %v1727_v17, %v606_v14  ;;  %v735_v18 = vadd.f32 %v1727_v17, %v734_v15  ;;  %v608_v19 = vpop.f32.mrb[13].mxu0  ;;  %v736_v20 = vpop.f32.mrb[13].mxu1 }
 0x140   :  { %v609_v21 = vpop.f32.mrb[14].mxu0  ;;  %v737_v22 = vpop.f32.mrb[14].mxu1 }
 0x141   :  { %v843_v23 = vmax.f32 %v607_v16, 0.0  ;;  %v875_v24 = vmax.f32 %v735_v18, 0.0  ;;  %v610_v25 = vadd.f32 %v1727_v17, %v609_v21  ;;  %v738_v26 = vadd.f32 %v1727_v17, %v737_v22  ;;  %v611_v27 = vpop.f32.mrb[15].mxu0  ;;  %v739_v28 = vpop.f32.mrb[15].mxu1 }
 0x143   :  { %v1378_v29 = vpack.c.bf16 %v843_v23, %v843_v23  ;;  %v1410_v30 = vpack.c.bf16 %v875_v24, %v875_v24  ;;  %v844_v31 = vmax.f32 %v610_v25, 0.0  ;;  %v876_v32 = vmax.f32 %v738_v26, 0.0 }
 0x145   :  { %1164 = vst.msk [vmem:[%s2052_s3 + $0x18] sm:$0xf] %vm1157_vm0, %v1378_v29  ;;  %1196 = vst.msk [vmem:[%s2052_s3 + $0x98] sm:$0xf] %vm1157_vm0, %v1410_v30  ;;  %v1379_v33 = vpack.c.bf16 %v844_v31, %v844_v31  ;;  %v1411_v34 = vpack.c.bf16 %v876_v32, %v876_v32 }
 0x146   :  { %v614_v35 = vpop.f32.mrb[16].mxu0  ;;  %v742_v36 = vpop.f32.mrb[16].mxu1 }
 0x147   :  { %1165 = vst.msk [vmem:[%s2052_s3 + $0x1c] sm:$0xf] %vm1157_vm0, %v1379_v33  ;;  %1197 = vst.msk [vmem:[%s2052_s3 + $0x9c] sm:$0xf] %vm1157_vm0, %v1411_v34  ;;  %v615_v37 = vadd.f32 %v1727_v17, %v614_v35  ;;  %v743_v38 = vadd.f32 %v1727_v17, %v742_v36  ;;  %v616_v39 = vpop.f32.mrb[17].mxu0  ;;  %v744_v40 = vpop.f32.mrb[17].mxu1 }
 0x148   :  { %v617_v41 = vpop.f32.mrb[18].mxu0  ;;  %v745_v42 = vpop.f32.mrb[18].mxu1 }
 0x149   :  { %v845_v43 = vmax.f32 %v615_v37, 0.0  ;;  %v877_v44 = vmax.f32 %v743_v38, 0.0  ;;  %v618_v45 = vadd.f32 %v1727_v17, %v617_v41  ;;  %v746_v46 = vadd.f32 %v1727_v17, %v745_v42  ;;  %v619_v47 = vpop.f32.mrb[19].mxu0  ;;  %v747_v48 = vpop.f32.mrb[19].mxu1 }
 0x14b   :  { %v1380_v49 = vpack.c.bf16 %v845_v43, %v845_v43  ;;  %v1412_v50 = vpack.c.bf16 %v877_v44, %v877_v44  ;;  %v846_v51 = vmax.f32 %v618_v45, 0.0  ;;  %v878_v52 = vmax.f32 %v746_v46, 0.0 }
 0x14d   :  { %1166 = vst.msk [vmem:[%s2052_s3 + $0x20] sm:$0xf] %vm1157_vm0, %v1380_v49  ;;  %1198 = vst.msk [vmem:[%s2052_s3 + $0xa0] sm:$0xf] %vm1157_vm0, %v1412_v50  ;;  %v1381_v53 = vpack.c.bf16 %v846_v51, %v846_v51  ;;  %v1413_v54 = vpack.c.bf16 %v878_v52, %v878_v52 }
 0x14e   :  { %v622_v55 = vpop.f32.mrb[20].mxu0  ;;  %v750_v56 = vpop.f32.mrb[20].mxu1 }
 0x14f   :  { %1167 = vst.msk [vmem:[%s2052_s3 + $0x24] sm:$0xf] %vm1157_vm0, %v1381_v53  ;;  %1199 = vst.msk [vmem:[%s2052_s3 + $0xa4] sm:$0xf] %vm1157_vm0, %v1413_v54  ;;  %v623_v57 = vadd.f32 %v1727_v17, %v622_v55  ;;  %v751_v58 = vadd.f32 %v1727_v17, %v750_v56  ;;  %v624_v59 = vpop.f32.mrb[21].mxu0  ;;  %v752_v60 = vpop.f32.mrb[21].mxu1 }
 0x150   :  { %v625_v61 = vpop.f32.mrb[22].mxu0  ;;  %v753_v62 = vpop.f32.mrb[22].mxu1 }
 0x151   :  { %v847_v63 = vmax.f32 %v623_v57, 0.0  ;;  %v879_v0 = vmax.f32 %v751_v58, 0.0  ;;  %v626_v1 = vadd.f32 %v1727_v17, %v625_v61  ;;  %v754_v2 = vadd.f32 %v1727_v17, %v753_v62  ;;  %v627_v3 = vpop.f32.mrb[23].mxu0  ;;  %v755_v4 = vpop.f32.mrb[23].mxu1 }
 0x153   :  { %v1382_v5 = vpack.c.bf16 %v847_v63, %v847_v63  ;;  %v1414_v6 = vpack.c.bf16 %v879_v0, %v879_v0  ;;  %v848_v7 = vmax.f32 %v626_v1, 0.0  ;;  %v880_v8 = vmax.f32 %v754_v2, 0.0 }
 0x155   :  { %1168 = vst.msk [vmem:[%s2052_s3 + $0x28] sm:$0xf] %vm1157_vm0, %v1382_v5  ;;  %1200 = vst.msk [vmem:[%s2052_s3 + $0xa8] sm:$0xf] %vm1157_vm0, %v1414_v6  ;;  %v1383_v9 = vpack.c.bf16 %v848_v7, %v848_v7  ;;  %v1415_v10 = vpack.c.bf16 %v880_v8, %v880_v8 }
 0x156   :  { %v630_v11 = vpop.f32.mrb[24].mxu0  ;;  %v758_v12 = vpop.f32.mrb[24].mxu1 }
 0x157   :  { %1169 = vst.msk [vmem:[%s2052_s3 + $0x2c] sm:$0xf] %vm1157_vm0, %v1383_v9  ;;  %1201 = vst.msk [vmem:[%s2052_s3 + $0xac] sm:$0xf] %vm1157_vm0, %v1415_v10  ;;  %v631_v13 = vadd.f32 %v1727_v17, %v630_v11  ;;  %v759_v14 = vadd.f32 %v1727_v17, %v758_v12  ;;  %v632_v15 = vpop.f32.mrb[25].mxu0  ;;  %v760_v16 = vpop.f32.mrb[25].mxu1 }
 0x158   :  { %v633_v18 = vpop.f32.mrb[26].mxu0  ;;  %v761_v19 = vpop.f32.mrb[26].mxu1 }
 0x159   :  { %v849_v20 = vmax.f32 %v631_v13, 0.0  ;;  %v881_v21 = vmax.f32 %v759_v14, 0.0  ;;  %v634_v22 = vadd.f32 %v1727_v17, %v633_v18  ;;  %v762_v23 = vadd.f32 %v1727_v17, %v761_v19  ;;  %v635_v24 = vpop.f32.mrb[27].mxu0  ;;  %v763_v25 = vpop.f32.mrb[27].mxu1 }
 0x15b   :  { %v1384_v26 = vpack.c.bf16 %v849_v20, %v849_v20  ;;  %v1416_v27 = vpack.c.bf16 %v881_v21, %v881_v21  ;;  %v850_v28 = vmax.f32 %v634_v22, 0.0  ;;  %v882_v29 = vmax.f32 %v762_v23, 0.0 }
 0x15d   :  { %1170 = vst.msk [vmem:[%s2052_s3 + $0x30] sm:$0xf] %vm1157_vm0, %v1384_v26  ;;  %1202 = vst.msk [vmem:[%s2052_s3 + $0xb0] sm:$0xf] %vm1157_vm0, %v1416_v27  ;;  %v1385_v30 = vpack.c.bf16 %v850_v28, %v850_v28  ;;  %v1417_v31 = vpack.c.bf16 %v882_v29, %v882_v29 }
 0x15e   :  { %v638_v32 = vpop.f32.mrb[28].mxu0  ;;  %v766_v33 = vpop.f32.mrb[28].mxu1 }
 0x15f   :  { %1171 = vst.msk [vmem:[%s2052_s3 + $0x34] sm:$0xf] %vm1157_vm0, %v1385_v30  ;;  %1203 = vst.msk [vmem:[%s2052_s3 + $0xb4] sm:$0xf] %vm1157_vm0, %v1417_v31  ;;  %v639_v34 = vadd.f32 %v1727_v17, %v638_v32  ;;  %v767_v35 = vadd.f32 %v1727_v17, %v766_v33  ;;  %v640_v36 = vpop.f32.mrb[29].mxu0  ;;  %v768_v37 = vpop.f32.mrb[29].mxu1 }
 0x160   :  { %v641_v38 = vpop.f32.mrb[30].mxu0  ;;  %v769_v39 = vpop.f32.mrb[30].mxu1 }
 0x161   :  { %v851_v40 = vmax.f32 %v639_v34, 0.0  ;;  %v883_v41 = vmax.f32 %v767_v35, 0.0  ;;  %v642_v42 = vadd.f32 %v1727_v17, %v641_v38  ;;  %v770_v43 = vadd.f32 %v1727_v17, %v769_v39  ;;  %v643_v44 = vpop.f32.mrb[31].mxu0  ;;  %v771_v45 = vpop.f32.mrb[31].mxu1 }
 0x163   :  { %v1386_v46 = vpack.c.bf16 %v851_v40, %v851_v40  ;;  %v1418_v47 = vpack.c.bf16 %v883_v41, %v883_v41  ;;  %v852_v48 = vmax.f32 %v642_v42, 0.0  ;;  %v884_v49 = vmax.f32 %v770_v43, 0.0 }
 0x165   :  { %1172 = vst.msk [vmem:[%s2052_s3 + $0x38] sm:$0xf] %vm1157_vm0, %v1386_v46  ;;  %1204 = vst.msk [vmem:[%s2052_s3 + $0xb8] sm:$0xf] %vm1157_vm0, %v1418_v47  ;;  %v1387_v50 = vpack.c.bf16 %v852_v48, %v852_v48  ;;  %v1419_v51 = vpack.c.bf16 %v884_v49, %v884_v49 }
 0x166   :  { %v646_v52 = vpop.f32.mrb[32].mxu0  ;;  %v774_v53 = vpop.f32.mrb[32].mxu1 }
 0x167   :  { %1173 = vst.msk [vmem:[%s2052_s3 + $0x3c] sm:$0xf] %vm1157_vm0, %v1387_v50  ;;  %1205 = vst.msk [vmem:[%s2052_s3 + $0xbc] sm:$0xf] %vm1157_vm0, %v1419_v51  ;;  %v647_v54 = vadd.f32 %v1727_v17, %v646_v52  ;;  %v775_v55 = vadd.f32 %v1727_v17, %v774_v53  ;;  %v648_v56 = vpop.f32.mrb[33].mxu0  ;;  %v776_v57 = vpop.f32.mrb[33].mxu1 }
 0x168   :  { %v649_v58 = vpop.f32.mrb[34].mxu0  ;;  %v777_v59 = vpop.f32.mrb[34].mxu1 }
 0x169   :  { %v853_v60 = vmax.f32 %v647_v54, 0.0  ;;  %v885_v61 = vmax.f32 %v775_v55, 0.0  ;;  %v650_v62 = vadd.f32 %v1727_v17, %v649_v58  ;;  %v778_v63 = vadd.f32 %v1727_v17, %v777_v59  ;;  %v651_v0 = vpop.f32.mrb[35].mxu0  ;;  %v779_v1 = vpop.f32.mrb[35].mxu1 }
 0x16b   :  { %v1388_v2 = vpack.c.bf16 %v853_v60, %v853_v60  ;;  %v1420_v3 = vpack.c.bf16 %v885_v61, %v885_v61  ;;  %v854_v4 = vmax.f32 %v650_v62, 0.0  ;;  %v886_v5 = vmax.f32 %v778_v63, 0.0 }
 0x16d   :  { %1174 = vst.msk [vmem:[%s2052_s3 + $0x40] sm:$0xf] %vm1157_vm0, %v1388_v2  ;;  %1206 = vst.msk [vmem:[%s2052_s3 + $0xc0] sm:$0xf] %vm1157_vm0, %v1420_v3  ;;  %v1389_v6 = vpack.c.bf16 %v854_v4, %v854_v4  ;;  %v1421_v7 = vpack.c.bf16 %v886_v5, %v886_v5 }
 0x16e   :  { %v654_v8 = vpop.f32.mrb[36].mxu0  ;;  %v782_v9 = vpop.f32.mrb[36].mxu1 }
 0x16f   :  { %1175 = vst.msk [vmem:[%s2052_s3 + $0x44] sm:$0xf] %vm1157_vm0, %v1389_v6  ;;  %1207 = vst.msk [vmem:[%s2052_s3 + $0xc4] sm:$0xf] %vm1157_vm0, %v1421_v7  ;;  %v655_v10 = vadd.f32 %v1727_v17, %v654_v8  ;;  %v783_v11 = vadd.f32 %v1727_v17, %v782_v9  ;;  %v656_v12 = vpop.f32.mrb[37].mxu0  ;;  %v784_v13 = vpop.f32.mrb[37].mxu1 }
 0x170   :  { %v657_v14 = vpop.f32.mrb[38].mxu0  ;;  %v785_v15 = vpop.f32.mrb[38].mxu1 }
 0x171   :  { %v855_v16 = vmax.f32 %v655_v10, 0.0  ;;  %v887_v18 = vmax.f32 %v783_v11, 0.0  ;;  %v658_v19 = vadd.f32 %v1727_v17, %v657_v14  ;;  %v786_v20 = vadd.f32 %v1727_v17, %v785_v15  ;;  %v659_v21 = vpop.f32.mrb[39].mxu0  ;;  %v787_v22 = vpop.f32.mrb[39].mxu1 }
 0x173   :  { %v1390_v23 = vpack.c.bf16 %v855_v16, %v855_v16  ;;  %v1422_v24 = vpack.c.bf16 %v887_v18, %v887_v18  ;;  %v856_v25 = vmax.f32 %v658_v19, 0.0  ;;  %v888_v26 = vmax.f32 %v786_v20, 0.0 }
 0x175   :  { %1176 = vst.msk [vmem:[%s2052_s3 + $0x48] sm:$0xf] %vm1157_vm0, %v1390_v23  ;;  %1208 = vst.msk [vmem:[%s2052_s3 + $0xc8] sm:$0xf] %vm1157_vm0, %v1422_v24  ;;  %v1391_v27 = vpack.c.bf16 %v856_v25, %v856_v25  ;;  %v1423_v28 = vpack.c.bf16 %v888_v26, %v888_v26 }
 0x176   :  { %v662_v29 = vpop.f32.mrb[40].mxu0  ;;  %v790_v30 = vpop.f32.mrb[40].mxu1 }
 0x177   :  { %1177 = vst.msk [vmem:[%s2052_s3 + $0x4c] sm:$0xf] %vm1157_vm0, %v1391_v27  ;;  %1209 = vst.msk [vmem:[%s2052_s3 + $0xcc] sm:$0xf] %vm1157_vm0, %v1423_v28  ;;  %v663_v31 = vadd.f32 %v1727_v17, %v662_v29  ;;  %v791_v32 = vadd.f32 %v1727_v17, %v790_v30  ;;  %v664_v33 = vpop.f32.mrb[41].mxu0  ;;  %v792_v34 = vpop.f32.mrb[41].mxu1 }
 0x178   :  { %v665_v35 = vpop.f32.mrb[42].mxu0  ;;  %v793_v36 = vpop.f32.mrb[42].mxu1 }
 0x179   :  { %v857_v37 = vmax.f32 %v663_v31, 0.0  ;;  %v889_v38 = vmax.f32 %v791_v32, 0.0  ;;  %v666_v39 = vadd.f32 %v1727_v17, %v665_v35  ;;  %v794_v40 = vadd.f32 %v1727_v17, %v793_v36  ;;  %v667_v41 = vpop.f32.mrb[43].mxu0  ;;  %v795_v42 = vpop.f32.mrb[43].mxu1 }
 0x17b   :  { %v1392_v43 = vpack.c.bf16 %v857_v37, %v857_v37  ;;  %v1424_v44 = vpack.c.bf16 %v889_v38, %v889_v38  ;;  %v858_v45 = vmax.f32 %v666_v39, 0.0  ;;  %v890_v46 = vmax.f32 %v794_v40, 0.0 }
 0x17d   :  { %1178 = vst.msk [vmem:[%s2052_s3 + $0x50] sm:$0xf] %vm1157_vm0, %v1392_v43  ;;  %1210 = vst.msk [vmem:[%s2052_s3 + $0xd0] sm:$0xf] %vm1157_vm0, %v1424_v44  ;;  %v1393_v47 = vpack.c.bf16 %v858_v45, %v858_v45  ;;  %v1425_v48 = vpack.c.bf16 %v890_v46, %v890_v46 }
 0x17e   :  { %v670_v49 = vpop.f32.mrb[44].mxu0  ;;  %v798_v50 = vpop.f32.mrb[44].mxu1 }
 0x17f   :  { %1179 = vst.msk [vmem:[%s2052_s3 + $0x54] sm:$0xf] %vm1157_vm0, %v1393_v47  ;;  %1211 = vst.msk [vmem:[%s2052_s3 + $0xd4] sm:$0xf] %vm1157_vm0, %v1425_v48  ;;  %v671_v51 = vadd.f32 %v1727_v17, %v670_v49  ;;  %v799_v52 = vadd.f32 %v1727_v17, %v798_v50  ;;  %v672_v53 = vpop.f32.mrb[45].mxu0  ;;  %v800_v54 = vpop.f32.mrb[45].mxu1 }
 0x180   :  { %v673_v55 = vpop.f32.mrb[46].mxu0  ;;  %v801_v56 = vpop.f32.mrb[46].mxu1 }
 0x181   :  { %v859_v57 = vmax.f32 %v671_v51, 0.0  ;;  %v891_v58 = vmax.f32 %v799_v52, 0.0  ;;  %v674_v59 = vadd.f32 %v1727_v17, %v673_v55  ;;  %v802_v60 = vadd.f32 %v1727_v17, %v801_v56  ;;  %v675_v61 = vpop.f32.mrb[47].mxu0  ;;  %v803_v62 = vpop.f32.mrb[47].mxu1 }
 0x183   :  { %v1394_v63 = vpack.c.bf16 %v859_v57, %v859_v57  ;;  %v1426_v0 = vpack.c.bf16 %v891_v58, %v891_v58  ;;  %v860_v1 = vmax.f32 %v674_v59, 0.0  ;;  %v892_v2 = vmax.f32 %v802_v60, 0.0 }
 0x185   :  { %1180 = vst.msk [vmem:[%s2052_s3 + $0x58] sm:$0xf] %vm1157_vm0, %v1394_v63  ;;  %1212 = vst.msk [vmem:[%s2052_s3 + $0xd8] sm:$0xf] %vm1157_vm0, %v1426_v0  ;;  %v1395_v3 = vpack.c.bf16 %v860_v1, %v860_v1  ;;  %v1427_v4 = vpack.c.bf16 %v892_v2, %v892_v2 }
 0x186   :  { %v678_v5 = vpop.f32.mrb[48].mxu0  ;;  %v806_v6 = vpop.f32.mrb[48].mxu1 }
 0x187   :  { %1181 = vst.msk [vmem:[%s2052_s3 + $0x5c] sm:$0xf] %vm1157_vm0, %v1395_v3  ;;  %1213 = vst.msk [vmem:[%s2052_s3 + $0xdc] sm:$0xf] %vm1157_vm0, %v1427_v4  ;;  %v679_v7 = vadd.f32 %v1727_v17, %v678_v5  ;;  %v807_v8 = vadd.f32 %v1727_v17, %v806_v6  ;;  %v680_v9 = vpop.f32.mrb[49].mxu0  ;;  %v808_v10 = vpop.f32.mrb[49].mxu1 }
 0x188   :  { %v681_v11 = vpop.f32.mrb[50].mxu0  ;;  %v809_v12 = vpop.f32.mrb[50].mxu1 }
 0x189   :  { %v861_v13 = vmax.f32 %v679_v7, 0.0  ;;  %v893_v14 = vmax.f32 %v807_v8, 0.0  ;;  %v682_v15 = vadd.f32 %v1727_v17, %v681_v11  ;;  %v810_v16 = vadd.f32 %v1727_v17, %v809_v12  ;;  %v683_v18 = vpop.f32.mrb[51].mxu0  ;;  %v811_v19 = vpop.f32.mrb[51].mxu1 }
 0x18b   :  { %v1396_v20 = vpack.c.bf16 %v861_v13, %v861_v13  ;;  %v1428_v21 = vpack.c.bf16 %v893_v14, %v893_v14  ;;  %v862_v22 = vmax.f32 %v682_v15, 0.0  ;;  %v894_v23 = vmax.f32 %v810_v16, 0.0 }
 0x18d   :  { %1182 = vst.msk [vmem:[%s2052_s3 + $0x60] sm:$0xf] %vm1157_vm0, %v1396_v20  ;;  %1214 = vst.msk [vmem:[%s2052_s3 + $0xe0] sm:$0xf] %vm1157_vm0, %v1428_v21  ;;  %v1397_v24 = vpack.c.bf16 %v862_v22, %v862_v22  ;;  %v1429_v25 = vpack.c.bf16 %v894_v23, %v894_v23 }
 0x18e   :  { %v686_v26 = vpop.f32.mrb[52].mxu0  ;;  %v814_v27 = vpop.f32.mrb[52].mxu1 }
 0x18f   :  { %1183 = vst.msk [vmem:[%s2052_s3 + $0x64] sm:$0xf] %vm1157_vm0, %v1397_v24  ;;  %1215 = vst.msk [vmem:[%s2052_s3 + $0xe4] sm:$0xf] %vm1157_vm0, %v1429_v25  ;;  %v687_v28 = vadd.f32 %v1727_v17, %v686_v26  ;;  %v815_v29 = vadd.f32 %v1727_v17, %v814_v27  ;;  %v688_v30 = vpop.f32.mrb[53].mxu0  ;;  %v816_v31 = vpop.f32.mrb[53].mxu1 }
 0x190   :  { %v689_v32 = vpop.f32.mrb[54].mxu0  ;;  %v817_v33 = vpop.f32.mrb[54].mxu1 }
 0x191   :  { %v863_v34 = vmax.f32 %v687_v28, 0.0  ;;  %v895_v35 = vmax.f32 %v815_v29, 0.0  ;;  %v690_v36 = vadd.f32 %v1727_v17, %v689_v32  ;;  %v818_v37 = vadd.f32 %v1727_v17, %v817_v33  ;;  %v691_v38 = vpop.f32.mrb[55].mxu0  ;;  %v819_v39 = vpop.f32.mrb[55].mxu1 }
 0x193   :  { %v1398_v40 = vpack.c.bf16 %v863_v34, %v863_v34  ;;  %v1430_v41 = vpack.c.bf16 %v895_v35, %v895_v35  ;;  %v864_v42 = vmax.f32 %v690_v36, 0.0  ;;  %v896_v43 = vmax.f32 %v818_v37, 0.0 }
 0x195   :  { %1184 = vst.msk [vmem:[%s2052_s3 + $0x68] sm:$0xf] %vm1157_vm0, %v1398_v40  ;;  %1216 = vst.msk [vmem:[%s2052_s3 + $0xe8] sm:$0xf] %vm1157_vm0, %v1430_v41  ;;  %v1399_v44 = vpack.c.bf16 %v864_v42, %v864_v42  ;;  %v1431_v45 = vpack.c.bf16 %v896_v43, %v896_v43 }
 0x196   :  { %v694_v46 = vpop.f32.mrb[56].mxu0  ;;  %v822_v47 = vpop.f32.mrb[56].mxu1 }
 0x197   :  { %1185 = vst.msk [vmem:[%s2052_s3 + $0x6c] sm:$0xf] %vm1157_vm0, %v1399_v44  ;;  %1217 = vst.msk [vmem:[%s2052_s3 + $0xec] sm:$0xf] %vm1157_vm0, %v1431_v45  ;;  %v695_v48 = vadd.f32 %v1727_v17, %v694_v46  ;;  %v823_v49 = vadd.f32 %v1727_v17, %v822_v47  ;;  %v696_v50 = vpop.f32.mrb[57].mxu0  ;;  %v824_v51 = vpop.f32.mrb[57].mxu1 }
 0x198   :  { %v697_v52 = vpop.f32.mrb[58].mxu0  ;;  %v825_v53 = vpop.f32.mrb[58].mxu1 }
 0x199   :  { %v865_v54 = vmax.f32 %v695_v48, 0.0  ;;  %v897_v55 = vmax.f32 %v823_v49, 0.0  ;;  %v698_v56 = vadd.f32 %v1727_v17, %v697_v52  ;;  %v826_v57 = vadd.f32 %v1727_v17, %v825_v53  ;;  %v699_v58 = vpop.f32.mrb[59].mxu0  ;;  %v827_v59 = vpop.f32.mrb[59].mxu1 }
 0x19b   :  { %v1400_v60 = vpack.c.bf16 %v865_v54, %v865_v54  ;;  %v1432_v61 = vpack.c.bf16 %v897_v55, %v897_v55  ;;  %v866_v62 = vmax.f32 %v698_v56, 0.0  ;;  %v898_v63 = vmax.f32 %v826_v57, 0.0 }
 0x19d   :  { %1186 = vst.msk [vmem:[%s2052_s3 + $0x70] sm:$0xf] %vm1157_vm0, %v1400_v60  ;;  %1218 = vst.msk [vmem:[%s2052_s3 + $0xf0] sm:$0xf] %vm1157_vm0, %v1432_v61  ;;  %v1401_v0 = vpack.c.bf16 %v866_v62, %v866_v62  ;;  %v1433_v1 = vpack.c.bf16 %v898_v63, %v898_v63 }
 0x19e   :  { %v702_v2 = vpop.f32.mrb[60].mxu0  ;;  %v830_v3 = vpop.f32.mrb[60].mxu1 }
 0x19f   :  { %1187 = vst.msk [vmem:[%s2052_s3 + $0x74] sm:$0xf] %vm1157_vm0, %v1401_v0  ;;  %1219 = vst.msk [vmem:[%s2052_s3 + $0xf4] sm:$0xf] %vm1157_vm0, %v1433_v1  ;;  %v703_v4 = vadd.f32 %v1727_v17, %v702_v2  ;;  %v831_v5 = vadd.f32 %v1727_v17, %v830_v3  ;;  %v704_v6 = vpop.f32.mrb[61].mxu0  ;;  %v832_v7 = vpop.f32.mrb[61].mxu1 }
 0x1a0   :  { %v705_v8 = vpop.f32.mrb[62].mxu0  ;;  %v833_v9 = vpop.f32.mrb[62].mxu1 }
 0x1a1   :  { %v867_v10 = vmax.f32 %v703_v4, 0.0  ;;  %v899_v11 = vmax.f32 %v831_v5, 0.0  ;;  %v706_v12 = vadd.f32 %v1727_v17, %v705_v8  ;;  %v834_v13 = vadd.f32 %v1727_v17, %v833_v9  ;;  %v707_v14 = vpop.f32.mrb[63].mxu0  ;;  %v835_v15 = vpop.f32.mrb[63].mxu1 }
 0x1a3   :  { %v1402_v16 = vpack.c.bf16 %v867_v10, %v867_v10  ;;  %v1434_v18 = vpack.c.bf16 %v899_v11, %v899_v11  ;;  %v868_v19 = vmax.f32 %v706_v12, 0.0  ;;  %v900_v20 = vmax.f32 %v834_v13, 0.0 }
 0x1a5   :  { %1188 = vst.msk [vmem:[%s2052_s3 + $0x78] sm:$0xf] %vm1157_vm0, %v1402_v16  ;;  %1220 = vst.msk [vmem:[%s2052_s3 + $0xf8] sm:$0xf] %vm1157_vm0, %v1434_v18  ;;  %v1403_v21 = vpack.c.bf16 %v868_v19, %v868_v19  ;;  %v1435_v22 = vpack.c.bf16 %v900_v20, %v900_v20 }
 0x1a7   :  { %1189 = vst.msk [vmem:[%s2052_s3 + $0x7c] sm:$0xf] %vm1157_vm0, %v1403_v21  ;;  %1221 = vst.msk [vmem:[%s2052_s3 + $0xfc] sm:$0xf] %vm1157_vm0, %v1435_v22 }
 0x1a8   :  { %1226 = vsyncpa [#allocation3], 1 }

</bundles_post_ra>
